<compile_context>
chip_gen: v6e
topology: v6e:2x2x1
jax: 0.10.0
libtpu: 0.0.40
codegen_flags: <defaults>
</compile_context>

<pallas_src>
import jax
import jax.numpy as jnp
from jax.experimental import pallas as pl
from jax.experimental.pallas import tpu as pltpu

HIDDEN = 128      # hidden width of the MLP (matches nn.Linear(., 128))
OUT_PAD = 128     # lane-dense padded head width (>= action_count)
TB_CAP = 2048     # batch-tile cap (review: 1024-2048; VMEM is not a constraint)


def _round_up(n, m):
    return ((n + m - 1) // m) * m


def _use_core_parallel():
    """True only on multi-TensorCore chips (v7x): CORE_PARALLEL actually splits
    the batch grid across the two TCs; elsewhere keep the known-good 'parallel'."""
    try:
        kind = jax.devices()[0].device_kind.lower().replace(" ", "")
    except Exception:
        return False
    return ("v7" in kind) or ("tpu7" in kind)


def _choose_tiling(batch, two_core):
    """Pick (TB, n_blocks). TB multiple of 8; if splitting across 2 TCs, force an
    even number of grid steps >= 2 so neither core idles / gets a 2+1 imbalance."""
    tb = min(TB_CAP, _round_up(batch, 8))
    n_blocks = -(-batch // tb)
    if two_core:
        if n_blocks < 2 or n_blocks % 2:
            n_blocks = max(2, n_blocks + (n_blocks % 2))
        tb = min(TB_CAP, _round_up(-(-batch // n_blocks), 8))
        n_blocks = -(-batch // tb)
        if n_blocks % 2:
            n_blocks += 1
    return tb, n_blocks


def mlp_kernel(x_ref, w1_ref, b1_ref, w2_ref, b2_ref, w3_ref, b3_ref, o_ref):
    # ---- Layer 1 on the VPU (K = obs_len is far too small for the MXU) ----
    # h1[b,:] = sum_k x[b,k] * w1[k,:]  + b1, then ReLU.  obs_len-term unroll.
    x = x_ref[...]                                   # (TB, obs_len) f32
    obs_len = w1_ref.shape[0]
    h1 = x[:, 0:1] * w1_ref[0:1, :]                  # (TB,1)*(1,128) -> (TB,128)
    for k in range(1, obs_len):
        h1 = h1 + x[:, k:k + 1] * w1_ref[k:k + 1, :]
    h1 = jnp.maximum(h1 + b1_ref[...], 0.0)

    # ---- Layer 2: MXU, bf16 inputs, f32 accumulate ----
    h2 = jnp.dot(h1.astype(jnp.bfloat16), w2_ref[...],
                 preferred_element_type=jnp.float32)
    h2 = jnp.maximum(h2 + b2_ref[...], 0.0)

    # ---- Layer 3: MXU head, zero-padded to OUT_PAD columns, bf16 writeback ----
    o = jnp.dot(h2.astype(jnp.bfloat16), w3_ref[...],
                preferred_element_type=jnp.float32)
    o_ref[...] = (o + b3_ref[...]).astype(o_ref.dtype)   # lane-dense bf16 store


def neural_network_forward(x, params, action_count):
    """Pallas forward pass of NeuralNetwork.linear_relu_stack.

    x: [B, obs_len] float32
    params: w1 [obs_len,128] f32, b1 [1,128] f32, w2 [128,128] bf16, b2 [1,128] f32,
            w3 [128,OUT_PAD] bf16 (zero-padded), b3 [1,OUT_PAD] f32 (zero-padded)
    returns: [B, action_count] float32 q-values
    """
    w1, b1 = params["w1"], params["b1"]
    w2, b2 = params["w2"], params["b2"]
    w3, b3 = params["w3"], params["b3"]
    B, obs_len = x.shape

    two_core = _use_core_parallel()
    TB, n_blocks = _choose_tiling(B, two_core)
    B_pad = TB * n_blocks
    if B_pad != B:
        x = jnp.pad(x, ((0, B_pad - B), (0, 0)))     # zero tail rows, sliced below

    batch_sem = getattr(pltpu, "CORE_PARALLEL", "parallel") if two_core else "parallel"

    # Advisory cost estimate so XLA schedules the call sensibly when fused.
    flops = 2 * B_pad * (obs_len * HIDDEN + HIDDEN * HIDDEN + HIDDEN * OUT_PAD)
    bytes_accessed = (B_pad * obs_len * 4 + B_pad * OUT_PAD * 2          # x in, o out
                      + obs_len * HIDDEN * 4 + HIDDEN * 4                # w1, b1
                      + HIDDEN * HIDDEN * 2 + HIDDEN * 4                 # w2, b2
                      + HIDDEN * OUT_PAD * 2 + OUT_PAD * 4)              # w3, b3

    out_padded = pl.pallas_call(
        mlp_kernel,
        out_shape=jax.ShapeDtypeStruct((B_pad, OUT_PAD), jnp.bfloat16),
        grid=(n_blocks,),
        in_specs=[
            pl.BlockSpec((TB, obs_len), lambda i: (i, 0)),      # x: walks batch
            pl.BlockSpec((obs_len, HIDDEN), lambda i: (0, 0)),  # w1: resident
            pl.BlockSpec((1, HIDDEN), lambda i: (0, 0)),        # b1: resident
            pl.BlockSpec((HIDDEN, HIDDEN), lambda i: (0, 0)),   # w2: resident
            pl.BlockSpec((1, HIDDEN), lambda i: (0, 0)),        # b2: resident
            pl.BlockSpec((HIDDEN, OUT_PAD), lambda i: (0, 0)),  # w3: resident
            pl.BlockSpec((1, OUT_PAD), lambda i: (0, 0)),       # b3: resident
        ],
        out_specs=pl.BlockSpec((TB, OUT_PAD), lambda i: (i, 0)),
        compiler_params=pltpu.CompilerParams(
            dimension_semantics=(batch_sem,),
        ),
        cost_estimate=pl.CostEstimate(flops=flops, transcendentals=0,
                                      bytes_accessed=bytes_accessed),
    )(x, w1, b1, w2, b2, w3, b3)

    # Drop padded rows / head columns (padding is exact: zero logits), f32 out.
    return out_padded[:B, :action_count].astype(jnp.float32)


def init_params(key, obs_len, action_count, hidden=HIDDEN):
    """Init mimicking torch.nn.Linear default (U[-1/sqrt(fan_in), +1/sqrt(fan_in)]).

    w1 stays f32 (tiny, consumed by the VPU); w2/w3 are bf16 (MXU inputs, halves
    weight DMA); biases f32. Head is zero-padded to OUT_PAD lane-dense columns.
    """
    ks = jax.random.split(key, 6)

    def linear(kw, kb, fan_in, fan_out):
        bound = 1.0 / jnp.sqrt(fan_in)
        w = jax.random.uniform(kw, (fan_in, fan_out), jnp.float32, -bound, bound)
        b = jax.random.uniform(kb, (1, fan_out), jnp.float32, -bound, bound)
        return w, b

    w1, b1 = linear(ks[0], ks[1], obs_len, hidden)
    w2, b2 = linear(ks[2], ks[3], hidden, hidden)
    w3, b3 = linear(ks[4], ks[5], hidden, action_count)

    w3 = jnp.pad(w3, ((0, 0), (0, OUT_PAD - action_count)))
    b3 = jnp.pad(b3, ((0, 0), (0, OUT_PAD - action_count)))

    return {
        "w1": w1, "b1": b1,                              # f32 (VPU layer)
        "w2": w2.astype(jnp.bfloat16), "b2": b2,
        "w3": w3.astype(jnp.bfloat16), "b3": b3,
    }


def reference_forward(x, p, action_count):
    """Plain-JAX f32 reference using the same stored weights."""
    w1 = p["w1"].astype(jnp.float32)
    w2 = p["w2"].astype(jnp.float32)
    w3 = p["w3"].astype(jnp.float32)
    h1 = jnp.maximum(x @ w1 + p["b1"], 0.0)
    h2 = jnp.maximum(h1 @ w2 + p["b2"], 0.0)
    out = h2 @ w3 + p["b3"]
    return out[:, :action_count]


if __name__ == "__main__":
    # Environment per docstring: observation_space_length = 6, action_count = 3.
    OBS_LEN, ACTION_COUNT, BATCH = 6, 3, 2

    key = jax.random.PRNGKey(0)
    k_params, k_x, k_x_big = jax.random.split(key, 3)
    params = init_params(k_params, OBS_LEN, ACTION_COUNT)

    # Small batch (per-env DQN action selection shape).
    x = jax.random.normal(k_x, (BATCH, OBS_LEN), jnp.float32)
    q_values = jax.block_until_ready(neural_network_forward(x, params, ACTION_COUNT))
    ref = reference_forward(x, params, ACTION_COUNT)
    assert q_values.shape == (BATCH, ACTION_COUNT)
    assert jnp.allclose(q_values, ref, atol=3e-2, rtol=3e-2)

    # Larger batch exercising batch tiling / tail padding (and the even-step
    # dual-core split when running on v7x).
    xb = jax.random.normal(k_x_big, (1050, OBS_LEN), jnp.float32)
    qb = jax.block_until_ready(neural_network_forward(xb, params, ACTION_COUNT))
    refb = reference_forward(xb, params, ACTION_COUNT)
    assert qb.shape == (1050, ACTION_COUNT)
    assert jnp.allclose(qb, refb, atol=3e-2, rtol=3e-2)

    print("KERNEL_OK")
</pallas_src>

<mosaic_0001>
module attributes {stable_mosaic.version = 11 : i64} {
  func.func @mlp_kernel(%arg0: i32, %arg1: memref<8x6xf32, #tpu.memory_space<vmem>>, %arg2: memref<6x128xf32, #tpu.memory_space<vmem>>, %arg3: memref<1x128xf32, #tpu.memory_space<vmem>>, %arg4: memref<128x128xbf16, #tpu.memory_space<vmem>>, %arg5: memref<1x128xf32, #tpu.memory_space<vmem>>, %arg6: memref<128x128xbf16, #tpu.memory_space<vmem>>, %arg7: memref<1x128xf32, #tpu.memory_space<vmem>>, %arg8: memref<8x128xbf16, #tpu.memory_space<vmem>>) attributes {dimension_semantics = [#tpu.dimension_semantics<parallel>], iteration_bounds = array<i64: 1>, scalar_prefetch = 0 : i64, scratch_operands = 0 : i64, tpu.core_type = #tpu.core_type<tc>, window_params = [{transform_indices = @transform_0, window_bounds = array<i64: 8, 6>}, {pipeline_mode = #tpu.pipeline_mode<synchronous>, transform_indices = @transform_1, window_bounds = array<i64: 6, 128>}, {pipeline_mode = #tpu.pipeline_mode<synchronous>, transform_indices = @transform_2, window_bounds = array<i64: 1, 128>}, {pipeline_mode = #tpu.pipeline_mode<synchronous>, transform_indices = @transform_3, window_bounds = array<i64: 128, 128>}, {pipeline_mode = #tpu.pipeline_mode<synchronous>, transform_indices = @transform_4, window_bounds = array<i64: 1, 128>}, {pipeline_mode = #tpu.pipeline_mode<synchronous>, transform_indices = @transform_5, window_bounds = array<i64: 128, 128>}, {pipeline_mode = #tpu.pipeline_mode<synchronous>, transform_indices = @transform_6, window_bounds = array<i64: 1, 128>}, {transform_indices = @transform_7, window_bounds = array<i64: 8, 128>}]} {
    %c0 = arith.constant 0 : index
    %c0_0 = arith.constant 0 : index
    %0 = vector.load %arg1[%c0, %c0_0] : memref<8x6xf32, #tpu.memory_space<vmem>>, vector<8x6xf32>
    %1 = vector.extract_strided_slice %0 {offsets = [0, 0], sizes = [8, 1], strides = [1, 1]} : vector<8x6xf32> to vector<8x1xf32>
    %c0_1 = arith.constant 0 : index
    %c0_2 = arith.constant 0 : index
    %2 = vector.load %arg2[%c0_1, %c0_2] : memref<6x128xf32, #tpu.memory_space<vmem>>, vector<1x128xf32>
    %3 = vector.broadcast %1 : vector<8x1xf32> to vector<8x128xf32>
    %4 = vector.broadcast %2 : vector<1x128xf32> to vector<8x128xf32>
    %5 = arith.mulf %3, %4 : vector<8x128xf32>
    %6 = vector.extract_strided_slice %0 {offsets = [0, 1], sizes = [8, 1], strides = [1, 1]} : vector<8x6xf32> to vector<8x1xf32>
    %c1 = arith.constant 1 : index
    %c0_3 = arith.constant 0 : index
    %7 = vector.load %arg2[%c1, %c0_3] : memref<6x128xf32, #tpu.memory_space<vmem>>, vector<1x128xf32>
    %8 = vector.broadcast %6 : vector<8x1xf32> to vector<8x128xf32>
    %9 = vector.broadcast %7 : vector<1x128xf32> to vector<8x128xf32>
    %10 = arith.mulf %8, %9 : vector<8x128xf32>
    %11 = arith.addf %5, %10 : vector<8x128xf32>
    %12 = vector.extract_strided_slice %0 {offsets = [0, 2], sizes = [8, 1], strides = [1, 1]} : vector<8x6xf32> to vector<8x1xf32>
    %c2 = arith.constant 2 : index
    %c0_4 = arith.constant 0 : index
    %13 = vector.load %arg2[%c2, %c0_4] : memref<6x128xf32, #tpu.memory_space<vmem>>, vector<1x128xf32>
    %14 = vector.broadcast %12 : vector<8x1xf32> to vector<8x128xf32>
    %15 = vector.broadcast %13 : vector<1x128xf32> to vector<8x128xf32>
    %16 = arith.mulf %14, %15 : vector<8x128xf32>
    %17 = arith.addf %11, %16 : vector<8x128xf32>
    %18 = vector.extract_strided_slice %0 {offsets = [0, 3], sizes = [8, 1], strides = [1, 1]} : vector<8x6xf32> to vector<8x1xf32>
    %c3 = arith.constant 3 : index
    %c0_5 = arith.constant 0 : index
    %19 = vector.load %arg2[%c3, %c0_5] : memref<6x128xf32, #tpu.memory_space<vmem>>, vector<1x128xf32>
    %20 = vector.broadcast %18 : vector<8x1xf32> to vector<8x128xf32>
    %21 = vector.broadcast %19 : vector<1x128xf32> to vector<8x128xf32>
    %22 = arith.mulf %20, %21 : vector<8x128xf32>
    %23 = arith.addf %17, %22 : vector<8x128xf32>
    %24 = vector.extract_strided_slice %0 {offsets = [0, 4], sizes = [8, 1], strides = [1, 1]} : vector<8x6xf32> to vector<8x1xf32>
    %c4 = arith.constant 4 : index
    %c0_6 = arith.constant 0 : index
    %25 = vector.load %arg2[%c4, %c0_6] : memref<6x128xf32, #tpu.memory_space<vmem>>, vector<1x128xf32>
    %26 = vector.broadcast %24 : vector<8x1xf32> to vector<8x128xf32>
    %27 = vector.broadcast %25 : vector<1x128xf32> to vector<8x128xf32>
    %28 = arith.mulf %26, %27 : vector<8x128xf32>
    %29 = arith.addf %23, %28 : vector<8x128xf32>
    %30 = vector.extract_strided_slice %0 {offsets = [0, 5], sizes = [8, 1], strides = [1, 1]} : vector<8x6xf32> to vector<8x1xf32>
    %c5 = arith.constant 5 : index
    %c0_7 = arith.constant 0 : index
    %31 = vector.load %arg2[%c5, %c0_7] : memref<6x128xf32, #tpu.memory_space<vmem>>, vector<1x128xf32>
    %32 = vector.broadcast %30 : vector<8x1xf32> to vector<8x128xf32>
    %33 = vector.broadcast %31 : vector<1x128xf32> to vector<8x128xf32>
    %34 = arith.mulf %32, %33 : vector<8x128xf32>
    %35 = arith.addf %29, %34 : vector<8x128xf32>
    %c0_8 = arith.constant 0 : index
    %c0_9 = arith.constant 0 : index
    %36 = vector.load %arg3[%c0_8, %c0_9] : memref<1x128xf32, #tpu.memory_space<vmem>>, vector<1x128xf32>
    %37 = vector.broadcast %36 : vector<1x128xf32> to vector<8x128xf32>
    %38 = arith.addf %35, %37 : vector<8x128xf32>
    %cst = arith.constant 0.000000e+00 : f32
    %39 = vector.broadcast %cst : f32 to vector<8x128xf32>
    %40 = arith.maximumf %38, %39 : vector<8x128xf32>
    %41 = arith.truncf %40 : vector<8x128xf32> to vector<8x128xbf16>
    %c0_10 = arith.constant 0 : index
    %c0_11 = arith.constant 0 : index
    %42 = vector.load %arg4[%c0_10, %c0_11] : memref<128x128xbf16, #tpu.memory_space<vmem>>, vector<128x128xbf16>
    %cst_12 = arith.constant dense<0.000000e+00> : vector<8x128xf32>
    %43 = tpu.matmul %41, %42, %cst_12 {dimension_numbers = #tpu.dot_dimension_numbers<[1], [0], [0], [1], [0, 0, 1, 1], [], []>} : vector<8x128xbf16>, vector<128x128xbf16>, vector<8x128xf32> -> vector<8x128xf32>
    %c0_13 = arith.constant 0 : index
    %c0_14 = arith.constant 0 : index
    %44 = vector.load %arg5[%c0_13, %c0_14] : memref<1x128xf32, #tpu.memory_space<vmem>>, vector<1x128xf32>
    %45 = vector.broadcast %44 : vector<1x128xf32> to vector<8x128xf32>
    %46 = arith.addf %43, %45 : vector<8x128xf32>
    %cst_15 = arith.constant 0.000000e+00 : f32
    %47 = vector.broadcast %cst_15 : f32 to vector<8x128xf32>
    %48 = arith.maximumf %46, %47 : vector<8x128xf32>
    %49 = arith.truncf %48 : vector<8x128xf32> to vector<8x128xbf16>
    %c0_16 = arith.constant 0 : index
    %c0_17 = arith.constant 0 : index
    %50 = vector.load %arg6[%c0_16, %c0_17] : memref<128x128xbf16, #tpu.memory_space<vmem>>, vector<128x128xbf16>
    %cst_18 = arith.constant dense<0.000000e+00> : vector<8x128xf32>
    %51 = tpu.matmul %49, %50, %cst_18 {dimension_numbers = #tpu.dot_dimension_numbers<[1], [0], [0], [1], [0, 0, 1, 1], [], []>} : vector<8x128xbf16>, vector<128x128xbf16>, vector<8x128xf32> -> vector<8x128xf32>
    %c0_19 = arith.constant 0 : index
    %c0_20 = arith.constant 0 : index
    %52 = vector.load %arg7[%c0_19, %c0_20] : memref<1x128xf32, #tpu.memory_space<vmem>>, vector<1x128xf32>
    %53 = vector.broadcast %52 : vector<1x128xf32> to vector<8x128xf32>
    %54 = arith.addf %51, %53 : vector<8x128xf32>
    %55 = arith.truncf %54 : vector<8x128xf32> to vector<8x128xbf16>
    %c0_21 = arith.constant 0 : index
    %c0_22 = arith.constant 0 : index
    %56 = vector.load %arg8[%c0_21, %c0_22] : memref<8x128xbf16, #tpu.memory_space<vmem>>, vector<8x128xbf16>
    tpu.vector_store %arg8[%c0_21, %c0_22], %55 {strides = array<i32>} : memref<8x128xbf16, #tpu.memory_space<vmem>>, vector<8x128xbf16>,
    return
  }
  func.func @transform_0(%arg0: i32) -> (i32, i32) {
    %c0_i32 = arith.constant 0 : i32
    %c0_i32_0 = arith.constant 0 : i32
    return %arg0, %c0_i32 : i32, i32
  }
  func.func @transform_1(%arg0: i32) -> (i32, i32) {
    %c0_i32 = arith.constant 0 : i32
    %c0_i32_0 = arith.constant 0 : i32
    %c0_i32_1 = arith.constant 0 : i32
    return %c0_i32, %c0_i32_0 : i32, i32
  }
  func.func @transform_2(%arg0: i32) -> (i32, i32) {
    %c0_i32 = arith.constant 0 : i32
    %c0_i32_0 = arith.constant 0 : i32
    %c0_i32_1 = arith.constant 0 : i32
    return %c0_i32, %c0_i32_0 : i32, i32
  }
  func.func @transform_3(%arg0: i32) -> (i32, i32) {
    %c0_i32 = arith.constant 0 : i32
    %c0_i32_0 = arith.constant 0 : i32
    %c0_i32_1 = arith.constant 0 : i32
    return %c0_i32, %c0_i32_0 : i32, i32
  }
  func.func @transform_4(%arg0: i32) -> (i32, i32) {
    %c0_i32 = arith.constant 0 : i32
    %c0_i32_0 = arith.constant 0 : i32
    %c0_i32_1 = arith.constant 0 : i32
    return %c0_i32, %c0_i32_0 : i32, i32
  }
  func.func @transform_5(%arg0: i32) -> (i32, i32) {
    %c0_i32 = arith.constant 0 : i32
    %c0_i32_0 = arith.constant 0 : i32
    %c0_i32_1 = arith.constant 0 : i32
    return %c0_i32, %c0_i32_0 : i32, i32
  }
  func.func @transform_6(%arg0: i32) -> (i32, i32) {
    %c0_i32 = arith.constant 0 : i32
    %c0_i32_0 = arith.constant 0 : i32
    %c0_i32_1 = arith.constant 0 : i32
    return %c0_i32, %c0_i32_0 : i32, i32
  }
  func.func @transform_7(%arg0: i32) -> (i32, i32) {
    %c0_i32 = arith.constant 0 : i32
    %c0_i32_0 = arith.constant 0 : i32
    return %arg0, %c0_i32 : i32, i32
  }
}

</mosaic_0001>

<bundles_post_ra>
// kernel: tpu_custom_call.1
= control target key start
LH: loop header
LB: loop body
LE: loop exit
PB: predicated region body
PF: predicated region fallthrough
CT: control target
= control target key end

     0   :  { %12 = vsyncpa [#allocation3], 0  ;;  %s724_s0 = inlined_call_operand.hbm [shape: f32[8,6], index: 0, kind: input, shape index: {}]   ;;  %s725_s1 = inlined_call_operand.hbm [shape: f32[6,128], index: 1, kind: input, shape index: {}]   ;;  %s726_s2 = inlined_call_operand.vmem [shape: f32[1,128], index: 2, kind: input, shape index: {}]   ;;  %s727_s3 = inlined_call_operand.hbm [shape: bf16[128,128], index: 3, kind: input, shape index: {}]   ;;  %s728_s4 = inlined_call_operand.vmem [shape: f32[1,128], index: 4, kind: input, shape index: {}]   ;;  %s729_s5 = inlined_call_operand.hbm [shape: bf16[128,128], index: 5, kind: input, shape index: {}]   ;;  %s730_s6 = inlined_call_operand.vmem [shape: f32[1,128], index: 6, kind: input, shape index: {}]   ;;  %s731_s7 = inlined_call_operand.hbm [shape: bf16[8,128], index: 7, kind: output, shape index: {}]  }
   0x1   :  { %13 = vsyncpa [#allocation6], 0 }
   0x2   :  { %14 = vsyncpa [#allocation9], 0 }
   0x3   :  { %15 = vsyncpa [#allocation4], 0  ;;  %s627_s24 = smov [#allocation5]   ;;  %s628_s26 = smov [#allocation2]  }
   0x4   :  { %s32_s25 = sshll.u32 %s627_s24, 4  ;;  %s22_s27 = sshll.u32 %s628_s26, 4  ;;  %s33_s25 = int_to_ptr.vmem [resolvable:$true] %s32_s25  ;;  %s23_s27 = int_to_ptr.vmem [resolvable:$true] %s22_s27 }
   0x5   :  { %s527_s28 = scalar_lea.vmem %s33_s25, 128  ;;  %p532_p1 = scmp.lt.s32.totalorder %s33_s25, %s33_s25 }
   0x6   :  { %p528_p0 = scmp.ne.s32.totalorder %s33_s25, %s527_s28  ;;  %p533_p2 = scmp.lt.s32.totalorder %s527_s28, %s527_s28 }
   0x8   :  { %p534_p3 = por %p533_p2, %p532_p1 }
   0xa   :  { %p535_p4 = pnand %p534_p3, %p528_p0 }
   0xc   :  { %538 = shalt.err (!%p535_p4)
}
   0xd   :  { %35 = dma.hbm_to_vmem [thread:$0]  %s725_s1, 128, %s33_s25, [#allocation6]  }
   0xe   :  { %s547_s8 = scalar_lea.vmem %s23_s27, 128  ;;  %p552_p6 = scmp.lt.s32.totalorder %s23_s27, %s23_s27 }
   0xf   :  { %p548_p5 = scmp.ne.s32.totalorder %s23_s27, %s547_s8  ;;  %p553_p7 = scmp.lt.s32.totalorder %s547_s8, %s547_s8 }
  0x11   :  { %p554_p8 = por %p553_p7, %p552_p6 }
  0x13   :  { %p555_p9 = pnand %p554_p8, %p548_p5 }
  0x15   :  { %558 = shalt.err (!%p555_p9)
}
  0x16   :  { %25 = dma.hbm_to_vmem [thread:$0]  %s724_s0, 128, %s23_s27, [#allocation3]  }
  0x17   :  { %s629_s11 = smov [#allocation7]  }
  0x18   :  { %s43_s12 = sshll.u32 %s629_s11, 4  ;;  %s44_s12 = int_to_ptr.vmem [resolvable:$true] %s43_s12 }
  0x19   :  { %s567_s13 = scalar_lea.vmem %s44_s12, 1024  ;;  %p572_p11 = scmp.lt.s32.totalorder %s44_s12, %s44_s12 }
  0x1a   :  { %p568_p10 = scmp.ne.s32.totalorder %s44_s12, %s567_s13  ;;  %p573_p12 = scmp.lt.s32.totalorder %s567_s13, %s567_s13 }
  0x1c   :  { %p574_p13 = por %p573_p12, %p572_p11 }
  0x1e   :  { %p575_p0 = pnand %p574_p13, %p568_p10 }
  0x20   :  { %578 = shalt.err (!%p575_p0)
}
  0x21   :  { %s630_s1 = smov 64   ;;  %s631_s14 = smov 4  }
  0x22   :  { %49 = dma.hbm_to_vmem [thread:$0]  %s727_s3, 1024, %s44_s12, [#allocation6], %s630_s1, %s630_s1, %s631_s14  }
  0x23   :  { %s632_s17 = smov [#allocation8]  }
  0x24   :  { %s57_s18 = sshll.u32 %s632_s17, 4  ;;  %s58_s18 = int_to_ptr.vmem [resolvable:$true] %s57_s18 }
  0x25   :  { %s587_s0 = scalar_lea.vmem %s58_s18, 1024  ;;  %p592_p2 = scmp.lt.s32.totalorder %s58_s18, %s58_s18 }
  0x26   :  { %p588_p1 = scmp.ne.s32.totalorder %s58_s18, %s587_s0  ;;  %p593_p3 = scmp.lt.s32.totalorder %s587_s0, %s587_s0 }
  0x28   :  { %p594_p4 = por %p593_p3, %p592_p2 }
  0x2a   :  { %p595_p5 = pnand %p594_p4, %p588_p1 }
  0x2c   :  { %598 = shalt.err (!%p595_p5)
}
  0x2d   :  { %63 = dma.hbm_to_vmem [thread:$0]  %s729_s5, 1024, %s58_s18, [#allocation9], %s630_s1, %s630_s1, %s631_s14  }
  0x2e   :  { %619 = dma.done.wait [#allocation3], 128  }
  0x2f   :  { %620 = vsyncadd [#allocation3], 4294967168 }
  0x30   :  { %621 = dma.done.wait [#allocation6], 1152  }
  0x31   :  { %622 = vsyncadd [#allocation6], 4294966144 }
  0x32   :  { %623 = dma.done.wait [#allocation9], 1024  }
  0x33   :  { %624 = vsyncadd [#allocation9], 4294966272  ;;  %v633_v0 = vmov 0   ;;  %v634_v1 = vmov 2   ;;  %v635_v2 = vmov 0.0   ;;  %v79_v3 = vld [vmem:[#allocation2] sm:$0xff] }
  0x34   :  { %497 = vset.pattern.permute.xlu0 %v633_v0  ;;  %499 = vset.pattern.permute.xlu1 %v634_v1  ;;  %v503_v4 = vld [vmem:[#allocation7 + $0x38] sm:$0xff]   ;;  %v504_v5 = vld [vmem:[#allocation7 + $0x30] sm:$0xff]   ;;  %v636_v6 = vmov 1   ;;  %v637_v7 = vmov 3   ;;  %v505_v8 = vld [vmem:[#allocation7 + $0x28] sm:$0xff]   ;;  %v638_v9 = vmov 4  }
  0x35   :  { %442 = vmatprep.subr.bf16.mxu0 %v635_v2  ;;  %462 = vmatprep.subr.bf16.mxu1 %v635_v2  ;;  %v639_v10 = vmov 5   ;;  %v506_v11 = vld [vmem:[#allocation7 + $0x20] sm:$0xff]   ;;  %vm640_vm0 = vmmov 0   ;;  %v507_v12 = vld [vmem:[#allocation7 + $0x18] sm:$0xff]   ;;  %v508_v13 = vld [vmem:[#allocation7 + $0x10] sm:$0xff]   ;;  %s641_s24 = smov [#allocation10]  }
  0x36   :  { %83 = vperm.xlu0 %497, %v79_v3   ;;  %104 = vperm.xlu1 %499, %v79_v3   ;;  %v511_v14 = vld [vmem:[#allocation8 + $0x38] sm:$0xff]   ;;  %v512_v15 = vld [vmem:[#allocation8 + $0x30] sm:$0xff]   ;;  %v509_v16 = vld [vmem:[#allocation7 + $0x8] sm:$0xff]   ;;  %s388_s25 = sshll.u32 %s641_s24, 4  ;;  %s389_s25 = int_to_ptr.vmem [resolvable:$true] %s388_s25 }
  0x37   :  { %443 = vmatpush3.bf16.msra.mxu0 %v503_v4  ;;  %458 = vmatprep.mubr.msk.bf16.mxu0 %vm640_vm0, %v635_v2  ;;  %v513_v17 = vld [vmem:[#allocation8 + $0x28] sm:$0xff]   ;;  %v510_v18 = vld [vmem:[#allocation7] sm:$0xff]   ;;  %v515_v20 = vld [vmem:[#allocation8 + $0x18] sm:$0xff]   ;;  %p604_p7 = scmp.lt.s32.totalorder %s389_s25, %s389_s25 }
  0x38   :  { %444 = vmatprep.subr.bf16.mxu0 %v635_v2  ;;  %478 = vmatprep.mubr.msk.bf16.mxu1 %vm640_vm0, %v635_v2  ;;  %v514_v19 = vld [vmem:[#allocation8 + $0x20] sm:$0xff]   ;;  %v516_v21 = vld [vmem:[#allocation8 + $0x10] sm:$0xff]   ;;  %v399_v24 = vld [vmem:[#allocation5] ss:$0 sm:$0xff] }
  0x39   :  { %463 = vmatpush3.bf16.msra.mxu1 %v511_v14  ;;  %v400_v25 = vld [vmem:[#allocation5 + $0x1] ss:$0 sm:$0xff]  ;;  %v401_v26 = vld [vmem:[#allocation5 + $0x2] ss:$0 sm:$0xff]  ;;  %v402_v31 = vld [vmem:[#allocation5 + $0x3] ss:$0 sm:$0xff] }
  0x3a   :  { %498 = vset.pattern.permute.xlu0 %v636_v6  ;;  %500 = vset.pattern.permute.xlu1 %v637_v7  ;;  %v403_v34 = vld [vmem:[#allocation5 + $0x4] ss:$0 sm:$0xff]  ;;  %v404_v35 = vld [vmem:[#allocation5 + $0x5] ss:$0 sm:$0xff]  ;;  %v405_v44 = vld [vmem:[%s726_s2] ss:$0 sm:$0xff] }
  0x3b   :  { %93 = vperm.xlu0 %498, %v79_v3   ;;  %115 = vperm.xlu1 %500, %v79_v3   ;;  %v517_v49 = vld [vmem:[#allocation8 + $0x8] sm:$0xff]   ;;  %v518_v50 = vld [vmem:[#allocation8] sm:$0xff]   ;;  %v406_v51 = vld [vmem:[%s728_s4] ss:$0 sm:$0xff]  ;;  %s599_s4 = scalar_lea.vmem %s389_s25, 64 }
  0x3c   :  { %445 = vmatpush3.bf16.msra.mxu0 %v504_v5  ;;  %464 = vmatprep.subr.bf16.mxu1 %v635_v2  ;;  %v415_v59 = vld [vmem:[%s730_s6] ss:$0 sm:$0xff]  ;;  %p600_p6 = scmp.ne.s32.totalorder %s389_s25, %s599_s4  ;;  %p605_p8 = scmp.lt.s32.totalorder %s599_s4, %s599_s4 }
  0x3d   :  { %446 = vmatprep.subr.bf16.mxu0 %v635_v2  ;;  %465 = vmatpush3.bf16.msra.mxu1 %v512_v15 }
  0x3e   :  { %466 = vmatprep.subr.bf16.mxu1 %v635_v2  ;;  %p606_p9 = por %p605_p8, %p604_p7 }
  0x3f   :  { %501 = vset.pattern.permute.xlu1 %v638_v9  ;;  %502 = vset.pattern.permute.xlu0 %v639_v10 }
  0x40   :  { %126 = vperm.xlu1 %501, %v79_v3   ;;  %137 = vperm.xlu0 %502, %v79_v3   ;;  %p607_p10 = pnand %p606_p9, %p600_p6 }
  0x41   :  { %447 = vmatpush3.bf16.msra.mxu0 %v505_v8  ;;  %467 = vmatpush3.bf16.msra.mxu1 %v513_v17 }
  0x42   :  { %448 = vmatprep.subr.bf16.mxu0 %v635_v2  ;;  %468 = vmatprep.subr.bf16.mxu1 %v635_v2 }
  0x45   :  { %449 = vmatpush3.bf16.msra.mxu0 %v506_v11  ;;  %469 = vmatpush3.bf16.msra.mxu1 %v514_v19 }
  0x46   :  { %450 = vmatprep.subr.bf16.mxu0 %v635_v2  ;;  %470 = vmatprep.subr.bf16.mxu1 %v635_v2 }
  0x49   :  { %451 = vmatpush3.bf16.msra.mxu0 %v507_v12  ;;  %471 = vmatpush3.bf16.msra.mxu1 %v515_v20 }
  0x4a   :  { %452 = vmatprep.subr.bf16.mxu0 %v635_v2  ;;  %472 = vmatprep.subr.bf16.mxu1 %v635_v2 }
  0x4d   :  { %453 = vmatpush3.bf16.msra.mxu0 %v508_v13  ;;  %473 = vmatpush3.bf16.msra.mxu1 %v516_v21 }
  0x4e   :  { %454 = vmatprep.subr.bf16.mxu0 %v635_v2  ;;  %474 = vmatprep.subr.bf16.mxu1 %v635_v2 }
  0x51   :  { %455 = vmatpush3.bf16.msra.mxu0 %v509_v16  ;;  %475 = vmatpush3.bf16.msra.mxu1 %v517_v49 }
  0x52   :  { %456 = vmatprep.subr.bf16.mxu0 %v635_v2  ;;  %476 = vmatprep.subr.bf16.mxu1 %v635_v2 }
  0x55   :  { %457 = vmatpush3.bf16.msra.mxu0 %v510_v18  ;;  %477 = vmatpush3.bf16.msra.mxu1 %v518_v50 }
  0xb1   :  { %v84_v22 = vpop.permute.xlu0 %83  ;;  %v105_v23 = vpop.permute.xlu1 %104 }
  0xb2   :  { %v90_v29 = vmul.f32 %v399_v24, %v84_v22  ;;  %v111_v32 = vmul.f32 %v401_v26, %v105_v23 }
  0xb6   :  { %v94_v27 = vpop.permute.xlu0 %93  ;;  %v116_v28 = vpop.permute.xlu1 %115 }
  0xb7   :  { %v100_v30 = vmul.f32 %v400_v25, %v94_v27  ;;  %v122_v37 = vmul.f32 %v402_v31, %v116_v28 }
  0xb9   :  { %v101_v33 = vadd.f32 %v100_v30, %v90_v29 }
  0xbb   :  { %v112_v36 = vadd.f32 %v111_v32, %v101_v33  ;;  %v127_v38 = vpop.permute.xlu1 %126  ;;  %v138_v39 = vpop.permute.xlu0 %137 }
  0xbc   :  { %v133_v40 = vmul.f32 %v403_v34, %v127_v38  ;;  %v144_v42 = vmul.f32 %v404_v35, %v138_v39 }
  0xbd   :  { %v123_v41 = vadd.f32 %v122_v37, %v112_v36 }
  0xbf   :  { %v134_v43 = vadd.f32 %v133_v40, %v123_v41 }
  0xc1   :  { %v145_v45 = vadd.f32 %v144_v42, %v134_v43 }
  0xc3   :  { %v153_v46 = vadd.f32 %v405_v44, %v145_v45 }
  0xc5   :  { %v154_v47 = vmax.f32 %v153_v46, 0.0 }
  0xc7   :  { %v155_v48 = vpack.c.bf16 %v154_v47, %v154_v47 }
  0xc9   :  { %459 = vmatmul.mubr.bf16.vlgmr.msra.gmra.mxu0 %v155_v48 }
 0x189   :  { %v261_v52 = vpop.f32.mrf.mxu0 }
 0x18a   :  { %v262_v53 = vadd.f32 %v406_v51, %v261_v52 }
 0x18b   :  { %v460_v54 = vpop.f32.mrf.mxu0 }
 0x18c   :  { %v267_v55 = vmax.f32 %v262_v53, 0.0 }
 0x18d   :  { %v264_v56 = vpop.f32.mrf.mxu0 }
 0x18e   :  { %v268_v57 = vpack.c.bf16 %v267_v55, %v267_v55 }
 0x18f   :  { %v461_v58 = vpop.f32.mrf.mxu0 }
 0x190   :  { %479 = vmatmul.mubr.bf16.vlgmr.msra.gmra.mxu1 %v268_v57 }
 0x250   :  { %v374_v60 = vpop.f32.mrf.mxu1 }
 0x251   :  { %v375_v61 = vadd.f32 %v415_v59, %v374_v60 }
 0x252   :  { %v480_v62 = vpop.f32.mrf.mxu1 }
 0x253   :  { %v380_v63 = vpack.c.bf16 %v375_v61, %v375_v61 }
 0x254   :  { %v377_v0 = vpop.f32.mrf.mxu1 }
 0x255   :  { %381 = vst [vmem:[#allocation10] sm:$0xf] %v380_v63 }
 0x256   :  { %v481_v1 = vpop.f32.mrf.mxu1 }
 0x257   :  { %610 = shalt.err (!%p607_p10)
}
 0x258   :  { %391 = dma.vmem_to_hbm [thread:$0]  %s389_s25, 64, %s731_s7, [#allocation4]  }
 0x259   :  { %625 = dma.done.wait [#allocation4], 64  }
 0x25a   :  { %626 = vsyncadd [#allocation4], 4294967232 }
 0x25b   :  { %395 = vsyncpa [#allocation3], 1 }
 0x25c   :  { %396 = vsyncpa [#allocation6], 1 }
 0x25d   :  { %397 = vsyncpa [#allocation9], 1 }
 0x25e   :  { %398 = vsyncpa [#allocation4], 1 }

</bundles_post_ra>
